<compile_context>
chip_gen: v5e
topology: v5e:2x2
jax: 0.10.0
libtpu: 0.0.40
codegen_flags: <defaults>
</compile_context>

<pallas_src>
import jax
import jax.numpy as jnp
from jax.experimental import pallas as pl
from jax.experimental.pallas import tpu as pltpu

_LANE = 128      # lane width (last dim)
_SUBLANE = 8     # sublane granularity (second-to-last dim)


def _round_up(x, m):
    return ((x + m - 1) // m) * m


def _leaky_relu(x, slope=0.2):
    return jnp.where(x > 0, x, slope * x)


def decoder_kernel(x_ref, w1_ref, b1_ref, w2_ref, b2_ref, w3_ref, b3_ref, o_ref):
    # Layer 1: Linear + LeakyReLU(0.2)   (Dropout is identity at inference)
    h1 = jnp.dot(x_ref[...], w1_ref[...], preferred_element_type=jnp.float32)
    h1 = _leaky_relu(h1 + b1_ref[...])                 # (TB, E) + (1, E)

    # Layer 2: Linear + LeakyReLU(0.2)
    h2 = jnp.dot(h1.astype(w2_ref.dtype), w2_ref[...],
                 preferred_element_type=jnp.float32)
    h2 = _leaky_relu(h2 + b2_ref[...])

    # Layer 3: Linear (no activation)
    out = jnp.dot(h2.astype(w3_ref.dtype), w3_ref[...],
                  preferred_element_type=jnp.float32)
    o_ref[...] = (out + b3_ref[...]).astype(o_ref.dtype)


def _choose_batch_tile(B, in_p, enc_p, out_p, mm_itemsize, io_itemsize,
                       max_tile, vmem_budget_bytes):
    """Largest sublane-aligned batch tile that keeps the pipeline in budget."""
    # Resident weights/biases (count x2: BlockSpec allocates double buffers
    # even for constant index maps).
    weight_bytes = 2 * mm_itemsize * (in_p * enc_p + enc_p * enc_p + enc_p * out_p)
    weight_bytes += 2 * 4 * (2 * enc_p + out_p)
    # Per batch-row cost: pipelined x tile (x2), pipelined out tile (x2),
    # plus f32 temporaries h1/h2 (roughly 2 live f32[enc_p] rows).
    per_row = 2 * mm_itemsize * in_p + 2 * io_itemsize * out_p + 2 * 4 * enc_p
    avail = max(vmem_budget_bytes - weight_bytes, _SUBLANE * per_row)
    tb = min(max_tile, avail // per_row)
    tb = max(_SUBLANE, (tb // _SUBLANE) * _SUBLANE)
    # No point tiling beyond the (sublane-rounded) batch itself.
    tb = min(tb, _round_up(B, _SUBLANE))
    return tb


def decoder_forward(x, params, *, batch_tile=2048, compute_dtype=None,
                    vmem_budget_bytes=20 * 1024 * 1024):
    """x: (B, input_size) float32. params: dict of w1,b1,w2,b2,w3,b3.

    batch_tile: upper bound on rows per grid step (actual tile is chosen to
      fit vmem_budget_bytes, conservative for v7x's 32 MiB scoped VMEM).
    compute_dtype: optional matmul-operand dtype (e.g. jnp.bfloat16 on
      v6e/v7x); accumulation/bias/activation stay f32.
    """
    w1, b1 = params["w1"], params["b1"]
    w2, b2 = params["w2"], params["b2"]
    w3, b3 = params["w3"], params["b3"]

    B, in_size = x.shape
    enc = w1.shape[1]
    out_size = w3.shape[1]
    io_dtype = x.dtype
    mm_dtype = io_dtype if compute_dtype is None else compute_dtype
    mm_itemsize = jnp.dtype(mm_dtype).itemsize
    io_itemsize = jnp.dtype(io_dtype).itemsize

    # Lane-dense padded feature dims.
    in_p = _round_up(in_size, _LANE)
    enc_p = _round_up(enc, _LANE)
    out_p = _round_up(out_size, _LANE)

    # Batch tiling (pad batch to a multiple of the tile).
    tb = _choose_batch_tile(B, in_p, enc_p, out_p, mm_itemsize, io_itemsize,
                            batch_tile, vmem_budget_bytes)
    b_p = _round_up(B, tb)
    grid = (b_p // tb,)

    def pad2(a, rows, cols, dtype):
        return jnp.pad(a, ((0, rows - a.shape[0]), (0, cols - a.shape[1]))).astype(dtype)

    xp = pad2(x, b_p, in_p, mm_dtype)
    w1p = pad2(w1, in_p, enc_p, mm_dtype)
    w2p = pad2(w2, enc_p, enc_p, mm_dtype)
    w3p = pad2(w3, enc_p, out_p, mm_dtype)
    b1p = pad2(b1, 1, enc_p, jnp.float32)
    b2p = pad2(b2, 1, enc_p, jnp.float32)
    b3p = pad2(b3, 1, out_p, jnp.float32)

    # x / out are pipelined along the batch axis; weights & biases stay resident.
    tiled = lambda shape: pl.BlockSpec(shape, lambda i: (i, 0))
    resident = lambda shape: pl.BlockSpec(shape, lambda i: (0, 0))

    flops = 2 * B * (in_size * enc + enc * enc + enc * out_size)
    bytes_accessed = (
        xp.size * mm_itemsize
        + (w1p.size + w2p.size + w3p.size) * mm_itemsize
        + (b1p.size + b2p.size + b3p.size) * 4
        + b_p * out_p * io_itemsize
    )

    out_padded = pl.pallas_call(
        decoder_kernel,
        out_shape=jax.ShapeDtypeStruct((b_p, out_p), io_dtype),
        grid=grid,
        in_specs=[
            tiled((tb, in_p)),
            resident((in_p, enc_p)), resident((1, enc_p)),
            resident((enc_p, enc_p)), resident((1, enc_p)),
            resident((enc_p, out_p)), resident((1, out_p)),
        ],
        out_specs=tiled((tb, out_p)),
        compiler_params=pltpu.CompilerParams(
            dimension_semantics=("parallel",),
        ),
        cost_estimate=pl.CostEstimate(
            flops=flops, transcendentals=0, bytes_accessed=bytes_accessed),
    )(xp, w1p, b1p, w2p, b2p, w3p, b3p)

    return out_padded[:B, :out_size]


def init_params(key, input_size, output_size, encoding_size, dtype=jnp.float32):
    """Deterministic synthetic init (Kaiming-uniform-ish scale like nn.Linear)."""
    ks = jax.random.split(key, 6)

    def lin(kw, kb, fan_in, fan_out):
        bound = 1.0 / jnp.sqrt(jnp.asarray(fan_in, dtype))
        w = jax.random.uniform(kw, (fan_in, fan_out), dtype, -bound, bound)
        b = jax.random.uniform(kb, (1, fan_out), dtype, -bound, bound)
        return w, b

    w1, b1 = lin(ks[0], ks[1], input_size, encoding_size)
    w2, b2 = lin(ks[2], ks[3], encoding_size, encoding_size)
    w3, b3 = lin(ks[4], ks[5], encoding_size, output_size)
    return {"w1": w1, "b1": b1, "w2": w2, "b2": b2, "w3": w3, "b3": b3}


def decoder_reference(x, p):
    """Pure-JAX reference for correctness check."""
    h = x @ p["w1"] + p["b1"]
    h = jnp.where(h > 0, h, 0.2 * h)
    h = h @ p["w2"] + p["b2"]
    h = jnp.where(h > 0, h, 0.2 * h)
    return h @ p["w3"] + p["b3"]


if __name__ == "__main__":
    key = jax.random.PRNGKey(0)
    k_x, k_p, k_big = jax.random.split(key, 3)

    batch = 8
    input_size = 32
    encoding_size = 64
    output_size = 16

    x = jax.random.normal(k_x, (batch, input_size), dtype=jnp.float32)
    params = init_params(k_p, input_size, output_size, encoding_size)

    out = decoder_forward(x, params)
    out = jax.block_until_ready(out)
    ref = decoder_reference(x, params)
    assert out.shape == (batch, output_size)
    assert jnp.allclose(out, ref, atol=1e-5, rtol=1e-5)

    # Exercise the multi-tile (pipelined, ragged-batch) path as well.
    big_b = 300
    x_big = jax.random.normal(k_big, (big_b, input_size), dtype=jnp.float32)
    out_big = jax.block_until_ready(
        decoder_forward(x_big, params, batch_tile=128))
    ref_big = decoder_reference(x_big, params)
    assert out_big.shape == (big_b, output_size)
    assert jnp.allclose(out_big, ref_big, atol=1e-5, rtol=1e-5)

    print("KERNEL_OK")
</pallas_src>

<mosaic_0001>
module attributes {stable_mosaic.version = 11 : i64} {
  func.func @decoder_kernel(%arg0: i32, %arg1: memref<8x128xf32, #tpu.memory_space<vmem>>, %arg2: memref<128x128xf32, #tpu.memory_space<vmem>>, %arg3: memref<1x128xf32, #tpu.memory_space<vmem>>, %arg4: memref<128x128xf32, #tpu.memory_space<vmem>>, %arg5: memref<1x128xf32, #tpu.memory_space<vmem>>, %arg6: memref<128x128xf32, #tpu.memory_space<vmem>>, %arg7: memref<1x128xf32, #tpu.memory_space<vmem>>, %arg8: memref<8x128xf32, #tpu.memory_space<vmem>>) attributes {dimension_semantics = [#tpu.dimension_semantics<parallel>], iteration_bounds = array<i64: 1>, scalar_prefetch = 0 : i64, scratch_operands = 0 : i64, tpu.core_type = #tpu.core_type<tc>, window_params = [{transform_indices = @transform_0, window_bounds = array<i64: 8, 128>}, {pipeline_mode = #tpu.pipeline_mode<synchronous>, transform_indices = @transform_1, window_bounds = array<i64: 128, 128>}, {pipeline_mode = #tpu.pipeline_mode<synchronous>, transform_indices = @transform_2, window_bounds = array<i64: 1, 128>}, {pipeline_mode = #tpu.pipeline_mode<synchronous>, transform_indices = @transform_3, window_bounds = array<i64: 128, 128>}, {pipeline_mode = #tpu.pipeline_mode<synchronous>, transform_indices = @transform_4, window_bounds = array<i64: 1, 128>}, {pipeline_mode = #tpu.pipeline_mode<synchronous>, transform_indices = @transform_5, window_bounds = array<i64: 128, 128>}, {pipeline_mode = #tpu.pipeline_mode<synchronous>, transform_indices = @transform_6, window_bounds = array<i64: 1, 128>}, {transform_indices = @transform_7, window_bounds = array<i64: 8, 128>}]} {
    %c0 = arith.constant 0 : index
    %c0_0 = arith.constant 0 : index
    %0 = vector.load %arg1[%c0, %c0_0] : memref<8x128xf32, #tpu.memory_space<vmem>>, vector<8x128xf32>
    %c0_1 = arith.constant 0 : index
    %c0_2 = arith.constant 0 : index
    %1 = vector.load %arg2[%c0_1, %c0_2] : memref<128x128xf32, #tpu.memory_space<vmem>>, vector<128x128xf32>
    %cst = arith.constant dense<0.000000e+00> : vector<8x128xf32>
    %2 = tpu.matmul %0, %1, %cst {dimension_numbers = #tpu.dot_dimension_numbers<[1], [0], [0], [1], [0, 0, 1, 1], [], []>} : vector<8x128xf32>, vector<128x128xf32>, vector<8x128xf32> -> vector<8x128xf32>
    %c0_3 = arith.constant 0 : index
    %c0_4 = arith.constant 0 : index
    %3 = vector.load %arg3[%c0_3, %c0_4] : memref<1x128xf32, #tpu.memory_space<vmem>>, vector<1x128xf32>
    %4 = vector.broadcast %3 : vector<1x128xf32> to vector<8x128xf32>
    %5 = arith.addf %2, %4 : vector<8x128xf32>
    %cst_5 = arith.constant 0.000000e+00 : f32
    %6 = vector.broadcast %cst_5 : f32 to vector<8x128xf32>
    %7 = arith.cmpf ogt, %5, %6 : vector<8x128xf32>
    %cst_6 = arith.constant 2.000000e-01 : f32
    %8 = vector.broadcast %cst_6 : f32 to vector<8x128xf32>
    %9 = arith.mulf %8, %5 : vector<8x128xf32>
    %10 = arith.select %7, %5, %9 : vector<8x128xi1>, vector<8x128xf32>
    %c0_7 = arith.constant 0 : index
    %c0_8 = arith.constant 0 : index
    %11 = vector.load %arg4[%c0_7, %c0_8] : memref<128x128xf32, #tpu.memory_space<vmem>>, vector<128x128xf32>
    %cst_9 = arith.constant dense<0.000000e+00> : vector<8x128xf32>
    %12 = tpu.matmul %10, %11, %cst_9 {dimension_numbers = #tpu.dot_dimension_numbers<[1], [0], [0], [1], [0, 0, 1, 1], [], []>} : vector<8x128xf32>, vector<128x128xf32>, vector<8x128xf32> -> vector<8x128xf32>
    %c0_10 = arith.constant 0 : index
    %c0_11 = arith.constant 0 : index
    %13 = vector.load %arg5[%c0_10, %c0_11] : memref<1x128xf32, #tpu.memory_space<vmem>>, vector<1x128xf32>
    %14 = vector.broadcast %13 : vector<1x128xf32> to vector<8x128xf32>
    %15 = arith.addf %12, %14 : vector<8x128xf32>
    %cst_12 = arith.constant 0.000000e+00 : f32
    %16 = vector.broadcast %cst_12 : f32 to vector<8x128xf32>
    %17 = arith.cmpf ogt, %15, %16 : vector<8x128xf32>
    %cst_13 = arith.constant 2.000000e-01 : f32
    %18 = vector.broadcast %cst_13 : f32 to vector<8x128xf32>
    %19 = arith.mulf %18, %15 : vector<8x128xf32>
    %20 = arith.select %17, %15, %19 : vector<8x128xi1>, vector<8x128xf32>
    %c0_14 = arith.constant 0 : index
    %c0_15 = arith.constant 0 : index
    %21 = vector.load %arg6[%c0_14, %c0_15] : memref<128x128xf32, #tpu.memory_space<vmem>>, vector<128x128xf32>
    %cst_16 = arith.constant dense<0.000000e+00> : vector<8x128xf32>
    %22 = tpu.matmul %20, %21, %cst_16 {dimension_numbers = #tpu.dot_dimension_numbers<[1], [0], [0], [1], [0, 0, 1, 1], [], []>} : vector<8x128xf32>, vector<128x128xf32>, vector<8x128xf32> -> vector<8x128xf32>
    %c0_17 = arith.constant 0 : index
    %c0_18 = arith.constant 0 : index
    %23 = vector.load %arg7[%c0_17, %c0_18] : memref<1x128xf32, #tpu.memory_space<vmem>>, vector<1x128xf32>
    %24 = vector.broadcast %23 : vector<1x128xf32> to vector<8x128xf32>
    %25 = arith.addf %22, %24 : vector<8x128xf32>
    %c0_19 = arith.constant 0 : index
    %c0_20 = arith.constant 0 : index
    %26 = vector.load %arg8[%c0_19, %c0_20] : memref<8x128xf32, #tpu.memory_space<vmem>>, vector<8x128xf32>
    tpu.vector_store %arg8[%c0_19, %c0_20], %25 {strides = array<i32>} : memref<8x128xf32, #tpu.memory_space<vmem>>, vector<8x128xf32>,
    return
  }
  func.func @transform_0(%arg0: i32) -> (i32, i32) {
    %c0_i32 = arith.constant 0 : i32
    %c0_i32_0 = arith.constant 0 : i32
    return %arg0, %c0_i32 : i32, i32
  }
  func.func @transform_1(%arg0: i32) -> (i32, i32) {
    %c0_i32 = arith.constant 0 : i32
    %c0_i32_0 = arith.constant 0 : i32
    %c0_i32_1 = arith.constant 0 : i32
    return %c0_i32, %c0_i32_0 : i32, i32
  }
  func.func @transform_2(%arg0: i32) -> (i32, i32) {
    %c0_i32 = arith.constant 0 : i32
    %c0_i32_0 = arith.constant 0 : i32
    %c0_i32_1 = arith.constant 0 : i32
    return %c0_i32, %c0_i32_0 : i32, i32
  }
  func.func @transform_3(%arg0: i32) -> (i32, i32) {
    %c0_i32 = arith.constant 0 : i32
    %c0_i32_0 = arith.constant 0 : i32
    %c0_i32_1 = arith.constant 0 : i32
    return %c0_i32, %c0_i32_0 : i32, i32
  }
  func.func @transform_4(%arg0: i32) -> (i32, i32) {
    %c0_i32 = arith.constant 0 : i32
    %c0_i32_0 = arith.constant 0 : i32
    %c0_i32_1 = arith.constant 0 : i32
    return %c0_i32, %c0_i32_0 : i32, i32
  }
  func.func @transform_5(%arg0: i32) -> (i32, i32) {
    %c0_i32 = arith.constant 0 : i32
    %c0_i32_0 = arith.constant 0 : i32
    %c0_i32_1 = arith.constant 0 : i32
    return %c0_i32, %c0_i32_0 : i32, i32
  }
  func.func @transform_6(%arg0: i32) -> (i32, i32) {
    %c0_i32 = arith.constant 0 : i32
    %c0_i32_0 = arith.constant 0 : i32
    %c0_i32_1 = arith.constant 0 : i32
    return %c0_i32, %c0_i32_0 : i32, i32
  }
  func.func @transform_7(%arg0: i32) -> (i32, i32) {
    %c0_i32 = arith.constant 0 : i32
    %c0_i32_0 = arith.constant 0 : i32
    return %arg0, %c0_i32 : i32, i32
  }
}

</mosaic_0001>

<bundles_post_ra>
// kernel: tpu_custom_call.1
= control target key start
LH: loop header
LB: loop body
LE: loop exit
PB: predicated region body
PF: predicated region fallthrough
CT: control target
= control target key end

     0   :  { %12 = vsyncpa [#allocation3], 0  ;;  %s444_s0 = inlined_call_operand.hbm [shape: f32[8,128], index: 0, kind: input, shape index: {}]   ;;  %s445_s1 = inlined_call_operand.hbm [shape: f32[128,128], index: 1, kind: input, shape index: {}]   ;;  %s446_s2 = inlined_call_operand.vmem [shape: f32[1,128], index: 2, kind: input, shape index: {}]   ;;  %s447_s3 = inlined_call_operand.hbm [shape: f32[128,128], index: 3, kind: input, shape index: {}]   ;;  %s448_s4 = inlined_call_operand.vmem [shape: f32[1,128], index: 4, kind: input, shape index: {}]   ;;  %s449_s5 = inlined_call_operand.hbm [shape: f32[128,128], index: 5, kind: input, shape index: {}]   ;;  %s450_s6 = inlined_call_operand.vmem [shape: f32[1,128], index: 6, kind: input, shape index: {}]   ;;  %s451_s7 = inlined_call_operand.hbm [shape: f32[8,128], index: 7, kind: output, shape index: {}]  }
   0x1   :  { %13 = vsyncpa [#allocation6], 0 }
   0x2   :  { %14 = vsyncpa [#allocation9], 0  ;;  %s31_s26 = sshll.u32 %s445_s1, 4  ;;  %s32_s26 = int_to_ptr.hbm [resolvable:$true] %s31_s26 }
   0x3   :  { %15 = vsyncpa [#allocation4], 0  ;;  %s373_s27 = smov [#allocation5]   ;;  %s21_s8 = sshll.u32 %s444_s0, 4  ;;  %s22_s8 = int_to_ptr.hbm [resolvable:$true] %s21_s8 }
   0x4   :  { %s33_s28 = sshll.u32 %s373_s27, 4  ;;  %s374_s9 = smov 128   ;;  %s34_s28 = int_to_ptr.vmem [resolvable:$true] %s33_s28 }
   0x5   :  { %s375_s10 = smov 8   ;;  %s376_s11 = smov [#allocation2]  }
   0x6   :  { %39 = dma.hbm_to_vmem [thread:$0]  %s32_s26, 2048, %s34_s28, [#allocation6], %s374_s9, %s374_s9, %s375_s10  }
   0x7   :  { %s23_s12 = sshll.u32 %s376_s11, 4  ;;  %s46_s15 = sshll.u32 %s447_s3, 4  ;;  %s24_s12 = int_to_ptr.vmem [resolvable:$true] %s23_s12  ;;  %s47_s15 = int_to_ptr.hbm [resolvable:$true] %s46_s15 }
   0x8   :  { %26 = dma.hbm_to_vmem [thread:$0]  %s22_s8, 128, %s24_s12, [#allocation3]  }
   0x9   :  { %s61_s17 = sshll.u32 %s449_s5, 4  ;;  %s377_s18 = smov [#allocation7]   ;;  %s62_s17 = int_to_ptr.hbm [resolvable:$true] %s61_s17 }
   0xa   :  { %s48_s19 = sshll.u32 %s377_s18, 4  ;;  %s378_s0 = smov [#allocation8]   ;;  %s49_s19 = int_to_ptr.vmem [resolvable:$true] %s48_s19 }
   0xb   :  { %54 = dma.hbm_to_vmem [thread:$0]  %s47_s15, 2048, %s49_s19, [#allocation6], %s374_s9, %s374_s9, %s375_s10  }
   0xc   :  { %s63_s20 = sshll.u32 %s378_s0, 4  ;;  %s64_s20 = int_to_ptr.vmem [resolvable:$true] %s63_s20 }
   0xd   :  { %69 = dma.hbm_to_vmem [thread:$0]  %s62_s17, 2048, %s64_s20, [#allocation9], %s374_s9, %s374_s9, %s375_s10  }
   0xe   :  { %365 = dma.done.wait [#allocation3], 128  }
   0xf   :  { %366 = vsyncadd [#allocation3], 4294967168 }
  0x10   :  { %367 = dma.done.wait [#allocation6], 4096  }
  0x11   :  { %368 = vsyncadd [#allocation6], 4294963200 }
  0x12   :  { %369 = dma.done.wait [#allocation9], 2048  }
  0x13   :  { %370 = vsyncadd [#allocation9], 4294965248  ;;  %v104_v0 = vld [vmem:[#allocation5 + $0x78] sm:$0xff]  ;;  %v103_v1 = vld [vmem:[#allocation5 + $0x70] sm:$0xff]  ;;  %s379_s24 = smov [#allocation10]   ;;  %s223_s28 = sshll.u32 %s451_s7, 4  ;;  %s224_s28 = int_to_ptr.hbm [resolvable:$true] %s223_s28 }
  0x14   :  { %109 = vmatpush.msra.mxu0 %v104_v0  ;;  %v102_v2 = vld [vmem:[#allocation5 + $0x68] sm:$0xff]  ;;  %v101_v3 = vld [vmem:[#allocation5 + $0x60] sm:$0xff]  ;;  %v147_v4 = vld [vmem:[#allocation7 + $0x78] sm:$0xff]  ;;  %s221_s25 = sshll.u32 %s379_s24, 4  ;;  %s222_s25 = int_to_ptr.vmem [resolvable:$true] %s221_s25 }
  0x15   :  { %v100_v5 = vld [vmem:[#allocation5 + $0x58] sm:$0xff]  ;;  %152 = vmatpush.msra.mxu1 %v147_v4  ;;  %v146_v6 = vld [vmem:[#allocation7 + $0x70] sm:$0xff]  ;;  %v145_v7 = vld [vmem:[#allocation7 + $0x68] sm:$0xff] }
  0x16   :  { %110 = vmatpush.msra.mxu0 %v103_v1  ;;  %v99_v8 = vld [vmem:[#allocation5 + $0x50] sm:$0xff]  ;;  %v144_v9 = vld [vmem:[#allocation7 + $0x60] sm:$0xff]  ;;  %v98_v10 = vld [vmem:[#allocation5 + $0x48] sm:$0xff] }
  0x17   :  { %153 = vmatpush.msra.mxu1 %v146_v6  ;;  %v143_v11 = vld [vmem:[#allocation7 + $0x58] sm:$0xff]  ;;  %v97_v12 = vld [vmem:[#allocation5 + $0x40] sm:$0xff]  ;;  %v142_v13 = vld [vmem:[#allocation7 + $0x50] sm:$0xff] }
  0x18   :  { %111 = vmatpush.msra.mxu0 %v102_v2  ;;  %v96_v14 = vld [vmem:[#allocation5 + $0x38] sm:$0xff]  ;;  %v141_v15 = vld [vmem:[#allocation7 + $0x48] sm:$0xff]  ;;  %v95_v16 = vld [vmem:[#allocation5 + $0x30] sm:$0xff] }
  0x19   :  { %154 = vmatpush.msra.mxu1 %v145_v7  ;;  %v140_v17 = vld [vmem:[#allocation7 + $0x40] sm:$0xff]  ;;  %v94_v18 = vld [vmem:[#allocation5 + $0x28] sm:$0xff]  ;;  %v139_v19 = vld [vmem:[#allocation7 + $0x38] sm:$0xff] }
  0x1a   :  { %112 = vmatpush.msra.mxu0 %v101_v3  ;;  %v93_v20 = vld [vmem:[#allocation5 + $0x20] sm:$0xff]  ;;  %v138_v21 = vld [vmem:[#allocation7 + $0x30] sm:$0xff]  ;;  %v92_v22 = vld [vmem:[#allocation5 + $0x18] sm:$0xff] }
  0x1b   :  { %155 = vmatpush.msra.mxu1 %v144_v9  ;;  %v137_v23 = vld [vmem:[#allocation7 + $0x28] sm:$0xff]  ;;  %v91_v24 = vld [vmem:[#allocation5 + $0x10] sm:$0xff]  ;;  %v136_v25 = vld [vmem:[#allocation7 + $0x20] sm:$0xff] }
  0x1c   :  { %113 = vmatpush.msra.mxu0 %v100_v5  ;;  %v90_v26 = vld [vmem:[#allocation5 + $0x8] sm:$0xff]  ;;  %v135_v27 = vld [vmem:[#allocation7 + $0x18] sm:$0xff]  ;;  %v89_v28 = vld [vmem:[#allocation5] sm:$0xff] }
  0x1d   :  { %156 = vmatpush.msra.mxu1 %v143_v11  ;;  %v88_v29 = vld [vmem:[#allocation2] sm:$0xff]  ;;  %v134_v30 = vld [vmem:[#allocation7 + $0x10] sm:$0xff]  ;;  %v133_v31 = vld [vmem:[#allocation7 + $0x8] sm:$0xff] }
  0x1e   :  { %114 = vmatpush.msra.mxu0 %v99_v8  ;;  %v132_v32 = vld [vmem:[#allocation7] sm:$0xff]  ;;  %v190_v33 = vld [vmem:[#allocation8 + $0x78] sm:$0xff]  ;;  %v189_v34 = vld [vmem:[#allocation8 + $0x70] sm:$0xff] }
  0x1f   :  { %157 = vmatpush.msra.mxu1 %v142_v13  ;;  %195 = vmatpush.msra.mxu2 %v190_v33  ;;  %v188_v35 = vld [vmem:[#allocation8 + $0x68] sm:$0xff]  ;;  %v187_v36 = vld [vmem:[#allocation8 + $0x60] sm:$0xff]  ;;  %v186_v37 = vld [vmem:[#allocation8 + $0x58] sm:$0xff] }
  0x20   :  { %115 = vmatpush.msra.mxu0 %v98_v10  ;;  %v185_v38 = vld [vmem:[#allocation8 + $0x50] sm:$0xff]  ;;  %v184_v39 = vld [vmem:[#allocation8 + $0x48] sm:$0xff]  ;;  %v183_v40 = vld [vmem:[#allocation8 + $0x40] sm:$0xff] }
  0x21   :  { %158 = vmatpush.msra.mxu1 %v141_v15  ;;  %196 = vmatpush.msra.mxu2 %v189_v34  ;;  %v182_v41 = vld [vmem:[#allocation8 + $0x38] sm:$0xff]  ;;  %v181_v42 = vld [vmem:[#allocation8 + $0x30] sm:$0xff]  ;;  %v180_v43 = vld [vmem:[#allocation8 + $0x28] sm:$0xff] }
  0x22   :  { %116 = vmatpush.msra.mxu0 %v97_v12  ;;  %v179_v44 = vld [vmem:[#allocation8 + $0x20] sm:$0xff]  ;;  %v178_v45 = vld [vmem:[#allocation8 + $0x18] sm:$0xff]  ;;  %v177_v51 = vld [vmem:[#allocation8 + $0x10] sm:$0xff] }
  0x23   :  { %159 = vmatpush.msra.mxu1 %v140_v17  ;;  %197 = vmatpush.msra.mxu2 %v188_v35  ;;  %v242_v46 = vld [vmem:[%s446_s2] ss:$0 sm:$0xff]  ;;  %v176_v52 = vld [vmem:[#allocation8 + $0x8] sm:$0xff]  ;;  %v175_v53 = vld [vmem:[#allocation8] sm:$0xff] }
  0x24   :  { %117 = vmatpush.msra.mxu0 %v96_v14  ;;  %v243_v54 = vld [vmem:[%s448_s4] ss:$0 sm:$0xff] }
  0x25   :  { %160 = vmatpush.msra.mxu1 %v139_v19  ;;  %198 = vmatpush.msra.mxu2 %v187_v36  ;;  %v244_v59 = vld [vmem:[%s450_s6] ss:$0 sm:$0xff] }
  0x26   :  { %118 = vmatpush.msra.mxu0 %v95_v16 }
  0x27   :  { %161 = vmatpush.msra.mxu1 %v138_v21  ;;  %199 = vmatpush.msra.mxu2 %v186_v37 }
  0x28   :  { %119 = vmatpush.msra.mxu0 %v94_v18 }
  0x29   :  { %162 = vmatpush.msra.mxu1 %v137_v23  ;;  %200 = vmatpush.msra.mxu2 %v185_v38 }
  0x2a   :  { %120 = vmatpush.msra.mxu0 %v93_v20 }
  0x2b   :  { %163 = vmatpush.msra.mxu1 %v136_v25  ;;  %201 = vmatpush.msra.mxu2 %v184_v39 }
  0x2c   :  { %121 = vmatpush.msra.mxu0 %v92_v22 }
  0x2d   :  { %164 = vmatpush.msra.mxu1 %v135_v27  ;;  %202 = vmatpush.msra.mxu2 %v183_v40 }
  0x2e   :  { %122 = vmatpush.msra.mxu0 %v91_v24 }
  0x2f   :  { %165 = vmatpush.msra.mxu1 %v134_v30  ;;  %203 = vmatpush.msra.mxu2 %v182_v41 }
  0x30   :  { %123 = vmatpush.msra.mxu0 %v90_v26 }
  0x31   :  { %166 = vmatpush.msra.mxu1 %v133_v31  ;;  %204 = vmatpush.msra.mxu2 %v181_v42 }
  0x32   :  { %124 = vmatpush.msra.mxu0 %v89_v28 }
  0x33   :  { %125 = vmatmul.f32.vlgmr.msra.gmra.mxu0 %v88_v29  ;;  %167 = vmatpush.msra.mxu1 %v132_v32 }
  0x34   :  { %205 = vmatpush.msra.mxu2 %v180_v43 }
  0x36   :  { %206 = vmatpush.msra.mxu2 %v179_v44 }
  0x38   :  { %207 = vmatpush.msra.mxu2 %v178_v45 }
  0x3a   :  { %208 = vmatpush.msra.mxu2 %v177_v51 }
  0x3c   :  { %209 = vmatpush.msra.mxu2 %v176_v52 }
  0x3e   :  { %210 = vmatpush.msra.mxu2 %v175_v53 }
  0xb0   :  { %v126_v47 = vpop.f32.mrf.mxu0 }
  0xb1   :  { %v127_v48 = vadd.f32 %v242_v46, %v126_v47 }
  0xb3   :  { %vm129_vm0 = vcmp.gt.f32.partialorder %v127_v48, 0.0  ;;  %v130_v49 = vmul.f32 0.2, %v127_v48 }
  0xb5   :  { %v131_v50 = vsel %vm129_vm0, %v127_v48, %v130_v49 }
  0xb6   :  { %168 = vmatmul.f32.vlgmr.msra.gmra.mxu1 %v131_v50 }
 0x133   :  { %v169_v55 = vpop.f32.mrf.mxu1 }
 0x134   :  { %v170_v56 = vadd.f32 %v243_v54, %v169_v55 }
 0x136   :  { %vm172_vm1 = vcmp.gt.f32.partialorder %v170_v56, 0.0  ;;  %v173_v57 = vmul.f32 0.2, %v170_v56 }
 0x138   :  { %v174_v58 = vsel %vm172_vm1, %v170_v56, %v173_v57 }
 0x139   :  { %211 = vmatmul.f32.vlgmr.msra.gmra.mxu2 %v174_v58 }
 0x1bc   :  { %v212_v60 = vpop.f32.mrf.mxu2 }
 0x1bd   :  { %v213_v61 = vadd.f32 %v244_v59, %v212_v60 }
 0x1bf   :  { %215 = vst [vmem:[#allocation10] sm:$0xff] %v213_v61 }
 0x1c0   :  { %226 = dma.vmem_to_hbm [thread:$0]  %s222_s25, 128, %s224_s28, [#allocation4]  }
 0x1c1   :  { %371 = dma.done.wait [#allocation4], 128  }
 0x1c2   :  { %372 = vsyncadd [#allocation4], 4294967168 }
 0x1c3   :  { %231 = vsyncpa [#allocation3], 1 }
 0x1c4   :  { %232 = vsyncpa [#allocation6], 1 }
 0x1c5   :  { %233 = vsyncpa [#allocation9], 1 }
 0x1c6   :  { %234 = vsyncpa [#allocation4], 1 }

</bundles_post_ra>
